<compile_context>
chip_gen: v5e
topology: v5e:2x2
jax: 0.10.0
libtpu: 0.0.40
codegen_flags: <defaults>
</compile_context>

<pallas_src>
import random

import jax
import jax.numpy as jnp
from jax.experimental import pallas as pl
from jax.experimental.pallas import tpu as pltpu


def _triplet_loss_kernel(pred_ref, targ_ref, pos_ref, neg_ref, out_ref, acc_ref):
    i = pl.program_id(0)
    tm = pred_ref.shape[0]        # rows in this tile
    n_total = pred_ref.shape[1]   # square (B, B) matrix: #cols == total #rows

    @pl.when(i == 0)
    def _():
        acc_ref[0] = jnp.float32(0.0)

    # Upcast in-register; VMEM / HBM traffic stays in the native dtype.
    diff = pred_ref[...].astype(jnp.float32) - targ_ref[...].astype(jnp.float32)

    pos_idx = pos_ref[...]        # (tm, 1) i32
    neg_idx = neg_ref[...]        # (tm, 1) i32

    # Fused in-kernel gather along axis 1 (VPU-friendly, no data-dependent
    # addressing): exactly one positive and one negative column per row.
    col = jax.lax.broadcasted_iota(jnp.int32, diff.shape, 1)
    sel = jnp.where(col == pos_idx, diff, 0.0) - jnp.where(col == neg_idx, diff, 0.0)
    loss_vec = jnp.maximum(jnp.sum(sel, axis=1, keepdims=True), 0.0)   # (tm, 1)

    # Mask padded rows of a partial last tile (divide by B, not padded count).
    row_ids = i * tm + jax.lax.broadcasted_iota(jnp.int32, (tm, 1), 0)
    loss_vec = jnp.where(row_ids < n_total, loss_vec, 0.0)

    acc_ref[0] += jnp.sum(loss_vec)

    @pl.when(i == pl.num_programs(0) - 1)
    def _():
        out_ref[0] = acc_ref[0] / jnp.float32(n_total)


def _pick_tile_rows(n_rows, n_cols, itemsize):
    """Rows per tile: as large as possible while 2 inputs x 2 pipeline
    buffers x TM x B x itemsize stays well under v5e's 16 MiB scoped VMEM."""
    budget_bytes = 12 * 1024 * 1024
    per_row_bytes = 4 * n_cols * max(itemsize, 1)     # 2 inputs x 2 buffers
    tm = budget_bytes // per_row_bytes
    tm = max(8, min(512, (tm // 8) * 8))              # multiple of 8 sublanes
    cap = max(8, (n_rows // 8) * 8)                   # no larger than needed
    return min(tm, cap)


def triplet_margin_loss_pallas(predict_distances, target_distances,
                               pos_index, neg_index):
    """mean(relu(pos_d - neg_d + (neg_t - pos_t))) on TPU."""
    B = predict_distances.shape[0]
    pos_i = pos_index.reshape(B, 1).astype(jnp.int32)
    neg_i = neg_index.reshape(B, 1).astype(jnp.int32)

    itemsize = jnp.dtype(predict_distances.dtype).itemsize
    tm = _pick_tile_rows(B, B, itemsize)
    grid = (pl.cdiv(B, tm),)

    cost = pl.CostEstimate(
        flops=6 * B * B,
        transcendentals=0,
        bytes_accessed=2 * B * B * itemsize + 2 * B * 4 + 4,
    )

    out = pl.pallas_call(
        _triplet_loss_kernel,
        out_shape=jax.ShapeDtypeStruct((1,), jnp.float32),
        grid=grid,
        in_specs=[
            pl.BlockSpec((tm, B), lambda i: (i, 0)),   # predict_distances
            pl.BlockSpec((tm, B), lambda i: (i, 0)),   # target_distances
            pl.BlockSpec((tm, 1), lambda i: (i, 0)),   # pos indices
            pl.BlockSpec((tm, 1), lambda i: (i, 0)),   # neg indices
        ],
        out_specs=pl.BlockSpec(memory_space=pltpu.MemorySpace.SMEM),
        scratch_shapes=[pltpu.SMEM((1,), jnp.float32)],
        compiler_params=pltpu.CompilerParams(dimension_semantics=("arbitrary",)),
        cost_estimate=cost,
    )(predict_distances, target_distances, pos_i, neg_i)
    return out[0]


class TripletMarginLoss:
    """JAX/Pallas port of the PyTorch TripletMarginLoss module."""

    def __init__(self, margin):
        # Stored (as in the reference module) but never used in forward; the
        # reference derives its threshold purely from target distances.
        self.margin = margin

    def get_pos_neg_index(self, target_distances):
        # Host-side glue replicating the PyTorch module's Python `random`
        # sampling logic (deterministic via random.seed at the call site).
        td = jax.device_get(target_distances)
        batch_size = td.shape[0]
        pos_index = [0] * batch_size
        neg_index = [0] * batch_size
        for i in range(batch_size):
            pi, pj = random.sample(range(batch_size), 2)
            while pi == i or pj == i:
                pi, pj = random.sample(range(batch_size), 2)
            if td[i][pi] > td[i][pj]:
                pos_index[i] = pi
                neg_index[i] = pj
            else:
                pos_index[i] = pj
                neg_index[i] = pi
        return (jnp.array(pos_index, dtype=jnp.int32),
                jnp.array(neg_index, dtype=jnp.int32))

    def forward(self, predict_distances, target_distances):
        pos_index, neg_index = self.get_pos_neg_index(target_distances)
        return triplet_margin_loss_pallas(
            predict_distances, target_distances, pos_index, neg_index)

    __call__ = forward


def _reference_loss(pred, targ, pos_index, neg_index):
    pd = jnp.take_along_axis(pred, pos_index[:, None], axis=1)
    nd = jnp.take_along_axis(pred, neg_index[:, None], axis=1)
    pt = jnp.take_along_axis(targ, pos_index[:, None], axis=1)
    nt = jnp.take_along_axis(targ, neg_index[:, None], axis=1)
    return jnp.mean(jnp.maximum(pd - nd + (nt - pt), 0.0))


if __name__ == "__main__":
    key = jax.random.PRNGKey(0)
    k1, k2, k3, k4 = jax.random.split(key, 4)

    loss_mod = TripletMarginLoss(margin=1.0)

    # --- Case 1: small B=8 (single grid step), validated against pure JAX ---
    B = 8
    predict_distances = jax.random.uniform(k1, (B, B), dtype=jnp.float32)
    target_distances = jax.random.uniform(k2, (B, B), dtype=jnp.float32)

    random.seed(0)
    pos_index, neg_index = loss_mod.get_pos_neg_index(target_distances)
    random.seed(0)  # forward re-samples the exact same indices
    loss = loss_mod(predict_distances, target_distances)
    jax.block_until_ready(loss)
    ref = _reference_loss(predict_distances, target_distances,
                          pos_index, neg_index)
    assert jnp.allclose(loss, ref, atol=1e-6, rtol=1e-6), (loss, ref)

    # --- Case 2: B not a multiple of the tile (exercises grid + row mask) ---
    B2 = 20
    pred2 = jax.random.uniform(k3, (B2, B2), dtype=jnp.float32)
    targ2 = jax.random.uniform(k4, (B2, B2), dtype=jnp.float32)
    random.seed(1)
    pos2, neg2 = loss_mod.get_pos_neg_index(targ2)
    loss2 = triplet_margin_loss_pallas(pred2, targ2, pos2, neg2)
    jax.block_until_ready(loss2)
    ref2 = _reference_loss(pred2, targ2, pos2, neg2)
    assert jnp.allclose(loss2, ref2, atol=1e-6, rtol=1e-6), (loss2, ref2)

    print("KERNEL_OK")
</pallas_src>

<mosaic_0001>
module attributes {stable_mosaic.version = 11 : i64} {
  func.func @_triplet_loss_kernel(%arg0: i32, %arg1: memref<8x8xf32, #tpu.memory_space<vmem>>, %arg2: memref<8x8xf32, #tpu.memory_space<vmem>>, %arg3: memref<8x1xi32, #tpu.memory_space<vmem>>, %arg4: memref<8x1xi32, #tpu.memory_space<vmem>>, %arg5: memref<1xf32, #tpu.memory_space<smem>>, %arg6: memref<1xf32, #tpu.memory_space<smem>>) attributes {dimension_semantics = [#tpu.dimension_semantics<arbitrary>], iteration_bounds = array<i64: 1>, scalar_prefetch = 0 : i64, scratch_operands = 1 : i64, tpu.core_type = #tpu.core_type<tc>, window_params = [{transform_indices = @transform_0, window_bounds = array<i64: 8, 8>}, {transform_indices = @transform_1, window_bounds = array<i64: 8, 8>}, {transform_indices = @transform_2, window_bounds = array<i64: 8, 1>}, {transform_indices = @transform_3, window_bounds = array<i64: 8, 1>}, {transform_indices = @transform_4, window_bounds = array<i64: 1>}]} {
    %c0_i32 = arith.constant 0 : i32
    %0 = arith.cmpi eq, %arg0, %c0_i32 : i32
    %1 = arith.extui %0 : i1 to i32
    %c0_i32_0 = arith.constant 0 : i32
    %2 = arith.cmpi ne, %1, %c0_i32_0 : i32
    scf.if %2 {
      %cst_18 = arith.constant 0.000000e+00 : f32
      %c0_19 = arith.constant 0 : index
      %40 = memref.load %arg6[%c0_19] : memref<1xf32, #tpu.memory_space<smem>>
      memref.store %cst_18, %arg6[%c0_19] : memref<1xf32, #tpu.memory_space<smem>>
    } else {
    }
    %c0 = arith.constant 0 : index
    %c0_1 = arith.constant 0 : index
    %3 = vector.load %arg1[%c0, %c0_1] : memref<8x8xf32, #tpu.memory_space<vmem>>, vector<8x8xf32>
    %c0_2 = arith.constant 0 : index
    %c0_3 = arith.constant 0 : index
    %4 = vector.load %arg2[%c0_2, %c0_3] : memref<8x8xf32, #tpu.memory_space<vmem>>, vector<8x8xf32>
    %5 = arith.subf %3, %4 : vector<8x8xf32>
    %c0_4 = arith.constant 0 : index
    %c0_5 = arith.constant 0 : index
    %6 = vector.load %arg3[%c0_4, %c0_5] : memref<8x1xi32, #tpu.memory_space<vmem>>, vector<8x1xi32>
    %c0_6 = arith.constant 0 : index
    %c0_7 = arith.constant 0 : index
    %7 = vector.load %arg4[%c0_6, %c0_7] : memref<8x1xi32, #tpu.memory_space<vmem>>, vector<8x1xi32>
    %8 = tpu.iota {dimensions = array<i32: 1>} : vector<8x8xi32>
    %9 = vector.broadcast %6 : vector<8x1xi32> to vector<8x8xi32>
    %10 = arith.cmpi eq, %8, %9 : vector<8x8xi32>
    %cst = arith.constant 0.000000e+00 : f32
    %11 = vector.broadcast %cst : f32 to vector<8x8xf32>
    %12 = arith.select %10, %5, %11 : vector<8x8xi1>, vector<8x8xf32>
    %13 = vector.broadcast %7 : vector<8x1xi32> to vector<8x8xi32>
    %14 = arith.cmpi eq, %8, %13 : vector<8x8xi32>
    %cst_8 = arith.constant 0.000000e+00 : f32
    %15 = vector.broadcast %cst_8 : f32 to vector<8x8xf32>
    %16 = arith.select %14, %5, %15 : vector<8x8xi1>, vector<8x8xf32>
    %17 = arith.subf %12, %16 : vector<8x8xf32>
    %cst_9 = arith.constant dense<0.000000e+00> : vector<8xf32>
    %18 = vector.multi_reduction <add>, %17, %cst_9 [1] : vector<8x8xf32> to vector<8xf32>
    %19 = vector.shape_cast %18 : vector<8xf32> to vector<8x1xf32>
    %cst_10 = arith.constant 0.000000e+00 : f32
    %20 = vector.broadcast %cst_10 : f32 to vector<8x1xf32>
    %21 = arith.maximumf %19, %20 : vector<8x1xf32>
    %c8_i32 = arith.constant 8 : i32
    %22 = arith.muli %arg0, %c8_i32 : i32
    %23 = tpu.iota {dimensions = array<i32: 0>} : vector<8x1xi32>
    %24 = vector.broadcast %22 : i32 to vector<8x1xi32>
    %25 = arith.addi %24, %23 : vector<8x1xi32>
    %c8_i32_11 = arith.constant 8 : i32
    %26 = vector.broadcast %c8_i32_11 : i32 to vector<8x1xi32>
    %27 = arith.cmpi slt, %25, %26 : vector<8x1xi32>
    %cst_12 = arith.constant 0.000000e+00 : f32
    %28 = vector.broadcast %cst_12 : f32 to vector<8x1xf32>
    %29 = arith.select %27, %21, %28 : vector<8x1xi1>, vector<8x1xf32>
    %c0_13 = arith.constant 0 : index
    %30 = memref.load %arg6[%c0_13] : memref<1xf32, #tpu.memory_space<smem>>
    %31 = vector.shape_cast %29 : vector<8x1xf32> to vector<1x8x1xf32>
    %cst_14 = arith.constant dense<0.000000e+00> : vector<1xf32>
    %32 = vector.multi_reduction <add>, %31, %cst_14 [1, 2] : vector<1x8x1xf32> to vector<1xf32>
    %33 = vector.shape_cast %32 : vector<1xf32> to vector<1x1x1xf32>
    %34 = vector.extract %33[0, 0, 0] : f32 from vector<1x1x1xf32>
    %35 = arith.addf %30, %34 : f32
    %c0_15 = arith.constant 0 : index
    %36 = memref.load %arg6[%c0_15] : memref<1xf32, #tpu.memory_space<smem>>
    memref.store %35, %arg6[%c0_15] : memref<1xf32, #tpu.memory_space<smem>>
    %c0_i32_16 = arith.constant 0 : i32
    %37 = arith.cmpi eq, %arg0, %c0_i32_16 : i32
    %38 = arith.extui %37 : i1 to i32
    %c0_i32_17 = arith.constant 0 : i32
    %39 = arith.cmpi ne, %38, %c0_i32_17 : i32
    scf.if %39 {
      %c0_18 = arith.constant 0 : index
      %40 = memref.load %arg6[%c0_18] : memref<1xf32, #tpu.memory_space<smem>>
      %cst_19 = arith.constant 8.000000e+00 : f32
      %41 = arith.divf %40, %cst_19 : f32
      %c0_20 = arith.constant 0 : index
      %42 = memref.load %arg5[%c0_20] : memref<1xf32, #tpu.memory_space<smem>>
      memref.store %41, %arg5[%c0_20] : memref<1xf32, #tpu.memory_space<smem>>
    } else {
    }
    return
  }
  func.func @transform_0(%arg0: i32) -> (i32, i32) {
    %c0_i32 = arith.constant 0 : i32
    %c0_i32_0 = arith.constant 0 : i32
    return %arg0, %c0_i32 : i32, i32
  }
  func.func @transform_1(%arg0: i32) -> (i32, i32) {
    %c0_i32 = arith.constant 0 : i32
    %c0_i32_0 = arith.constant 0 : i32
    return %arg0, %c0_i32 : i32, i32
  }
  func.func @transform_2(%arg0: i32) -> (i32, i32) {
    %c0_i32 = arith.constant 0 : i32
    %c0_i32_0 = arith.constant 0 : i32
    return %arg0, %c0_i32 : i32, i32
  }
  func.func @transform_3(%arg0: i32) -> (i32, i32) {
    %c0_i32 = arith.constant 0 : i32
    %c0_i32_0 = arith.constant 0 : i32
    return %arg0, %c0_i32 : i32, i32
  }
  func.func @transform_4(%arg0: i32) -> i32 {
    %c0_i32 = arith.constant 0 : i32
    %c0_i32_0 = arith.constant 0 : i32
    return %c0_i32 : i32
  }
}

</mosaic_0001>

<bundles_post_ra>
// kernel: tpu_custom_call.1
= control target key start
LH: loop header
LB: loop body
LE: loop exit
PB: predicated region body
PF: predicated region fallthrough
CT: control target
= control target key end

     0   :  { %s166_s0 = inlined_call_operand.vmem [shape: f32[8,8], index: 0, kind: input, shape index: {}]   ;;  %s167_s1 = inlined_call_operand.vmem [shape: f32[8,8], index: 1, kind: input, shape index: {}]   ;;  %s168_s2 = inlined_call_operand.vmem [shape: s32[8,1], index: 2, kind: input, shape index: {}]   ;;  %s169_s3 = inlined_call_operand.vmem [shape: s32[8,1], index: 3, kind: input, shape index: {}]   ;;  %s170_s4 = inlined_call_operand.hbm [shape: f32[1], index: 4, kind: output, shape index: {}]  }
   0x1   :  { %v27_v0 = vld [vmem:[%s168_s2] sm:$0xff] }
   0x2   :  { %9 = vsyncpa [#allocation4], 0  ;;  %v123_v1 = vmov 0   ;;  %v28_v2 = vld [vmem:[%s169_s3] sm:$0xff]  ;;  %v29_v3 = vlaneseq  ;;  %vm42_vm2 = vcmask 64512   ;;  %vm55_vm3 = vcmask 7168  }
   0x3   :  { %106 = vset.pattern.permute.xlu0 %v123_v1  ;;  %v24_v6 = vld [vmem:[%s166_s0] sm:$0xff]  ;;  %v124_v17 = vmov 8.0   ;;  %s89_s2 = sshll.u32 %s170_s4, 4  ;;  %s125_s25 = smov [#allocation3]   ;;  %s90_s2 = int_to_ptr.hbm [resolvable:$true] %s89_s2 }
   0x4   :  { %32 = vperm.xlu0 %106, %v27_v0   ;;  %v30_v5 = vand.u32 127, %v29_v3  ;;  %v25_v7 = vld [vmem:[%s167_s1] sm:$0xff]  ;;  %107 = vrcp.f32 %v124_v17 }
   0x5   :  { %v26_v8 = vsub.f32 %v24_v6, %v25_v7 }
   0xa   :  { %v108_v18 = vpop.eup %107 }
   0xb   :  { %v74_v19 = vmul.f32 8.0, %v108_v18  ;;  %vm78_vm4 = vweird.f32 %v108_v18 }
   0xc   :  { %37 = vperm.xlu0 %106, %v28_v2  }
   0xd   :  { %v75_v20 = vsub.f32 1.0, %v74_v19 }
   0xf   :  { %v76_v24 = vmul.f32 %v108_v18, %v75_v20 }
  0x11   :  { %v77_v27 = vadd.f32 %v108_v18, %v76_v24 }
  0x13   :  { %v79_v30 = vsel %vm78_vm4, %v108_v18, %v77_v27 }
  0x76   :  { %v33_v4 = vpop.permute.xlu0 %32 }
  0x77   :  { %vm34_vm0 = vcmp.eq.s32.totalorder %v30_v5, %v33_v4 }
  0x78   :  { %v35_v10 = vsel %vm34_vm0, %v26_v8, 0.0 }
  0x7e   :  { %v38_v9 = vpop.permute.xlu0 %37 }
  0x7f   :  { %vm39_vm1 = vcmp.eq.s32.totalorder %v30_v5, %v38_v9 }
  0x80   :  { %v40_v11 = vsel %vm39_vm1, %v26_v8, 0.0 }
  0x81   :  { %v41_v12 = vsub.f32 %v35_v10, %v40_v11 }
  0x83   :  { %v43_v13 = vsel %vm42_vm2, %v41_v12, 0.0 }
  0x84   :  { %44 = vadd.xlane.f32.xlu1 %v43_v13 }
  0xf7   :  { %v45_v14 = vpop.xlane.xlu1 %44 }
  0xf8   :  { %v46_v15 = vmax.f32 %v45_v14, 0.0 }
  0xfa   :  { %v56_v16 = vsel %vm55_vm3, %v46_v15, 0.0 }
  0xfb   :  { %57 = vadd.xlane.f32.xlu1 %v56_v16 }
 0x16e   :  { %v58_v21 = vpop.xlane.xlu1 %57 }
 0x16f   :  { %v59_v22 = vrot.slane %v58_v21, 4 }
 0x171   :  { %v60_v23 = vadd.f32 %v59_v22, %v58_v21 }
 0x173   :  { %v61_v25 = vrot.slane %v60_v23, 2 }
 0x175   :  { %v62_v26 = vadd.f32 %v61_v25, %v60_v23 }
 0x177   :  { %v63_v28 = vrot.slane %v62_v26, 1 }
 0x179   :  { %v64_v29 = vadd.f32 %v63_v28, %v62_v26 }
 0x17b   :  { %99 = vpush %v64_v29 }
 0x17c   :  { %101 = vpush %v79_v30 }
 0x1ac   :  { %s100_s3 = spop %99 }
 0x1ad   :  { %s102_s23 = spop %101 }
 0x1ae   :  { %s81_s24 = smul.f32 %s102_s23, %s100_s3 }
 0x1b0   :  { %83 = sst [smem:[#allocation3]] %s81_s24 }
 0x1b1   :  { %92 = dma.smem_to_hbm %s125_s25, 16, %s90_s2, [#allocation4]  }
 0x1b2   :  { %121 = dma.done.wait [#allocation4], 16  }
 0x1b3   :  { %122 = vsyncadd [#allocation4], 4294967280 }
 0x1b4   :  { %97 = sfence }
 0x1b5   :  { %98 = vsyncpa [#allocation4], 1 }

</bundles_post_ra>
